<compile_context>
chip_gen: v7x
topology: tpu7x:2x2x1
jax: 0.10.0
libtpu: 0.0.40
codegen_flags: <defaults>
</compile_context>

<pallas_src>
import functools

import numpy as np
import jax
import jax.numpy as jnp
from jax import lax
from jax.experimental import pallas as pl
from jax.experimental.pallas import tpu as pltpu


# ----------------------------------------------------------------------------
# Pallas kernel: one image per grid step, fully fused post-im2col pipeline.
# All large tensors are (rows, HW) with HW on the lane dim -> lane-dense loads/stores.
# ----------------------------------------------------------------------------
def _splat_kernel(p_ref, wc_ref, w1_ref, w2_ref,
                  bn0s_ref, bn0b_ref, bn1s_ref, bn1b_ref, b2_ref,
                  pmat_ref, rmat_ref, o_ref, *, radix, hw):
    # Grouped conv (zero-densified weights) as ONE merged bf16 MXU matmul.
    y = jnp.dot(wc_ref[...], p_ref[...], preferred_element_type=jnp.float32)    # (Cr, HW) f32
    # bn0 (inference affine) + relu, full width.
    y = jnp.maximum(y * bn0s_ref[...] + bn0b_ref[...], 0.0)

    # adaptive_avg_pool2d(., 1) of the radix-sum: lane reduce -> (Cr, 1), then 0/1 radix-sum
    # matmul -> (channels, 1).  No narrow lane slicing.
    gap_cr = jnp.sum(y, axis=1, keepdims=True) * (1.0 / float(hw))               # (Cr, 1)
    rmat = rmat_ref[...]                                                         # (channels, Cr)
    gap = jnp.dot(rmat, gap_cr, preferred_element_type=jnp.float32)              # (channels, 1)

    # fc1 -> bn1 (fc1 bias pre-folded into the shift) -> relu
    g1 = jnp.dot(w1_ref[...], gap, preferred_element_type=jnp.float32)           # (inter, 1)
    g1 = jnp.maximum(g1 * bn1s_ref[...] + bn1b_ref[...], 0.0)

    # fc2 + bias: attention logits in PyTorch flat (group, radix, j) order.
    att = jnp.dot(w2_ref[...], g1, preferred_element_type=jnp.float32) + b2_ref[...]  # (Cr, 1)

    if radix > 1:
        # rSoftMax: softmax over radix within each (group, intra-group-channel) partner set.
        # Subtracting the single global max is valid (same constant inside every set) and
        # stable for BN'd logits; partner sums come from a tiny 0/1 matmul; exact division.
        m = jnp.max(att, axis=0, keepdims=True)
        e = jnp.exp(att - m)
        s = jnp.dot(pmat_ref[...], e, preferred_element_type=jnp.float32)
        a = e / s                                                                 # (Cr, 1)
        # Attention-weighted radix fusion, fully lane-dense:
        #   out[c, s] = sum_r a[r*C + c] * y[r*C + c, s] == rmat @ (a * y)
        ya = (y * a).astype(jnp.bfloat16)                                         # (Cr, HW)
        out = jnp.dot(rmat.astype(jnp.bfloat16), ya,
                      preferred_element_type=jnp.float32)                         # (channels, HW)
    else:
        a = 1.0 / (1.0 + jnp.exp(-att))                                           # sigmoid
        out = y * a

    o_ref[...] = out.astype(o_ref.dtype)   # single lane-dense (channels, HW) store


# ----------------------------------------------------------------------------
# Glue: im2col in "transposed" layout (B, Cin*kh*kw, OH*OW) -- spatial on lanes.
# Feature order is (Cin, kh, kw), matching the OIHW weight flatten.
# ----------------------------------------------------------------------------
def _im2col_t(x, kh, kw, stride, padding, dilation):
    B, C, H, W = x.shape
    xp = jnp.pad(x, ((0, 0), (0, 0), (padding, padding), (padding, padding)))
    OH = (H + 2 * padding - dilation * (kh - 1) - 1) // stride + 1
    OW = (W + 2 * padding - dilation * (kw - 1) - 1) // stride + 1
    cols = []
    for i in range(kh):
        for j in range(kw):
            si, sj = i * dilation, j * dilation
            cols.append(xp[:, :, si:si + stride * (OH - 1) + 1:stride,
                                 sj:sj + stride * (OW - 1) + 1:stride])   # (B, C, OH, OW)
    col = jnp.stack(cols, axis=2)                       # (B, C, kh*kw, OH, OW)
    return col.reshape(B, C * kh * kw, OH * OW), OH, OW


def _vmem_limit_bytes(ck, hw, cr, channels, inter):
    # Per-step estimate: double-buffered bf16 patch slab + double-buffered f32 output slab
    # + post-BN/ReLU f32 activation + bf16 copy for the fusion matmul + resident weights
    # + headroom for compiler scratch / relayouts.
    est = (2 * ck * hw * 2
           + 2 * channels * hw * 4
           + cr * hw * 4
           + cr * hw * 2
           + cr * ck * 2 + inter * channels * 4 + cr * inter * 4
           + cr * cr * 4 + channels * cr * 4
           + (4 << 20))
    cap = 64 << 20                       # conservative default (v7x per-TensorCore VMEM)
    try:                                 # generation-aware: 128 MiB on v5e/v6e
        info = pltpu.get_tpu_info()
        cap = int(getattr(info, "vmem_capacity_bytes", cap) or cap)
    except Exception:
        pass
    return int(min(max(est, 16 << 20), int(0.75 * cap)))


def splat_conv2d_forward(x, params, *, channels, radix, groups,
                         kernel_size, stride, padding, dilation):
    B = x.shape[0]
    patches, OH, OW = _im2col_t(x, kernel_size, kernel_size, stride, padding, dilation)
    HW = OH * OW
    CK = patches.shape[1]
    Cr = channels * radix
    inter = params["fc1_w_dense"].shape[0]
    cpg = channels // groups

    # Zero-densified grouped conv weight, (Cr, CK) bf16 -> one merged matmul in-kernel.
    wc = params["conv_w_dense"].reshape(Cr, CK).astype(jnp.bfloat16)
    w1 = params["fc1_w_dense"].astype(jnp.float32)                        # (inter, channels)
    w2 = params["fc2_w_dense"].astype(jnp.float32)                        # (Cr, inter)
    b2 = params["fc2_b"].reshape(Cr, 1).astype(jnp.float32)

    bn0s = params["bn0_scale"].reshape(Cr, 1).astype(jnp.float32)
    bn0b = params["bn0_shift"].reshape(Cr, 1).astype(jnp.float32)
    bn1s = params["bn1_scale"].reshape(inter, 1).astype(jnp.float32)
    # fold fc1 bias into bn1 shift: (z + b1)*s1 + sh1 == z*s1 + (b1*s1 + sh1)
    bn1b = (params["fc1_b"] * params["bn1_scale"]
            + params["bn1_shift"]).reshape(inter, 1).astype(jnp.float32)

    # rSoftMax partner-sum matrix: pmat[f, n] = 1 iff flat attention positions f and n belong
    # to the same softmax normalization set (same group g, same intra-group index j).
    pmat_np = np.zeros((Cr, Cr), np.float32)
    rc = radix * cpg
    for g in range(groups):
        for j in range(cpg):
            idxs = [g * rc + r * cpg + j for r in range(radix)]
            for a_ in idxs:
                for b_ in idxs:
                    pmat_np[a_, b_] = 1.0
    pmat = jnp.asarray(pmat_np)

    # Radix-sum matrix: rmat[c, r*channels + c] = 1 (branch flat order is (radix, channels)).
    rmat_np = np.zeros((channels, Cr), np.float32)
    for r in range(radix):
        for c in range(channels):
            rmat_np[c, r * channels + c] = 1.0
    rmat = jnp.asarray(rmat_np)

    kernel = functools.partial(_splat_kernel, radix=radix, hw=HW)

    out = pl.pallas_call(
        kernel,
        out_shape=jax.ShapeDtypeStruct((B, channels, HW), jnp.float32),
        grid=(B,),
        in_specs=[
            pl.BlockSpec((None, CK, HW), lambda b: (b, 0, 0)),   # per-image patch slab (bf16)
            pl.BlockSpec((Cr, CK), lambda b: (0, 0)),            # conv weight (resident)
            pl.BlockSpec((inter, channels), lambda b: (0, 0)),
            pl.BlockSpec((Cr, inter), lambda b: (0, 0)),
            pl.BlockSpec((Cr, 1), lambda b: (0, 0)),
            pl.BlockSpec((Cr, 1), lambda b: (0, 0)),
            pl.BlockSpec((inter, 1), lambda b: (0, 0)),
            pl.BlockSpec((inter, 1), lambda b: (0, 0)),
            pl.BlockSpec((Cr, 1), lambda b: (0, 0)),
            pl.BlockSpec((Cr, Cr), lambda b: (0, 0)),
            pl.BlockSpec((channels, Cr), lambda b: (0, 0)),
        ],
        out_specs=pl.BlockSpec((None, channels, HW), lambda b: (b, 0, 0)),
        compiler_params=pltpu.CompilerParams(
            dimension_semantics=("parallel",),
            vmem_limit_bytes=_vmem_limit_bytes(CK, HW, Cr, channels, inter)),
    )(patches.astype(jnp.bfloat16), wc, w1, w2, bn0s, bn0b, bn1s, bn1b, b2, pmat, rmat)

    # Output is already channels-first; just restore the spatial dims (no transpose).
    return out.reshape(B, channels, OH, OW)


# ----------------------------------------------------------------------------
# Deterministic synthetic parameters (shapes follow the PyTorch module's __init__)
# ----------------------------------------------------------------------------
def make_params(key, in_channels, channels, kernel_size, groups, radix, reduction_factor=4):
    eps = 1e-5
    Cr = channels * radix
    G = groups * radix
    inter = max(in_channels * radix // reduction_factor, 32)
    ks = jax.random.split(key, 12)

    conv_w = 0.2 * jax.random.normal(ks[0], (Cr, in_channels // G, kernel_size, kernel_size),
                                     jnp.float32)
    conv_w_dense = jnp.zeros((Cr, in_channels, kernel_size, kernel_size), jnp.float32)
    cin_g, cout_g = in_channels // G, Cr // G
    for g in range(G):
        conv_w_dense = conv_w_dense.at[g * cout_g:(g + 1) * cout_g,
                                       g * cin_g:(g + 1) * cin_g].set(
            conv_w[g * cout_g:(g + 1) * cout_g])

    def bn(key_a, key_b, key_c, key_d, n):
        gamma = 1.0 + 0.1 * jax.random.normal(key_a, (n,), jnp.float32)
        beta = 0.1 * jax.random.normal(key_b, (n,), jnp.float32)
        mean = 0.05 * jax.random.normal(key_c, (n,), jnp.float32)
        var = jnp.abs(1.0 + 0.1 * jax.random.normal(key_d, (n,), jnp.float32))
        scale = gamma / jnp.sqrt(var + eps)
        shift = beta - mean * scale
        return scale, shift

    bn0_scale, bn0_shift = bn(ks[1], ks[2], ks[3], ks[4], Cr)

    fc1_w = 0.2 * jax.random.normal(ks[5], (inter, channels // groups), jnp.float32)
    fc1_w_dense = jnp.zeros((inter, channels), jnp.float32)
    ipg, cpg = inter // groups, channels // groups
    for g in range(groups):
        fc1_w_dense = fc1_w_dense.at[g * ipg:(g + 1) * ipg,
                                     g * cpg:(g + 1) * cpg].set(fc1_w[g * ipg:(g + 1) * ipg])
    fc1_b = 0.1 * jax.random.normal(ks[6], (inter,), jnp.float32)

    bn1_scale, bn1_shift = bn(ks[7], ks[8], ks[9], ks[10], inter)

    fc2_w = 0.2 * jax.random.normal(ks[11], (Cr, inter // groups), jnp.float32)
    fc2_w_dense = jnp.zeros((Cr, inter), jnp.float32)
    rcpg = Cr // groups
    for g in range(groups):
        fc2_w_dense = fc2_w_dense.at[g * rcpg:(g + 1) * rcpg,
                                     g * ipg:(g + 1) * ipg].set(fc2_w[g * rcpg:(g + 1) * rcpg])
    fc2_b = 0.1 * jax.random.normal(jax.random.fold_in(key, 99), (Cr,), jnp.float32)

    return dict(conv_w=conv_w, conv_w_dense=conv_w_dense,
                bn0_scale=bn0_scale, bn0_shift=bn0_shift,
                fc1_w_dense=fc1_w_dense, fc1_b=fc1_b,
                bn1_scale=bn1_scale, bn1_shift=bn1_shift,
                fc2_w_dense=fc2_w_dense, fc2_b=fc2_b)


# ----------------------------------------------------------------------------
# Pure-JAX reference (mirrors the PyTorch forward, inference-mode BN)
# ----------------------------------------------------------------------------
def reference_forward(x, params, *, channels, radix, groups, stride, padding, dilation):
    G = groups * radix
    y = lax.conv_general_dilated(x, params["conv_w"], (stride, stride),
                                 [(padding, padding), (padding, padding)],
                                 rhs_dilation=(dilation, dilation),
                                 feature_group_count=G,
                                 dimension_numbers=("NCHW", "OIHW", "NCHW"))
    y = y * params["bn0_scale"][None, :, None, None] + params["bn0_shift"][None, :, None, None]
    y = jnp.maximum(y, 0.0)
    B, Cr, H, W = y.shape
    if radix > 1:
        yr = y.reshape(B, radix, channels, H, W)
        gap = yr.sum(axis=1)
    else:
        gap = y
    gap = gap.mean(axis=(2, 3))                                     # (B, channels)
    g1 = gap @ params["fc1_w_dense"].T + params["fc1_b"]
    g1 = jnp.maximum(g1 * params["bn1_scale"] + params["bn1_shift"], 0.0)
    att = g1 @ params["fc2_w_dense"].T + params["fc2_b"]            # (B, Cr)
    if radix > 1:
        a = att.reshape(B, groups, radix, -1)
        a = jax.nn.softmax(a, axis=2).reshape(B, Cr)
        a = a.reshape(B, radix, channels, 1, 1)
        out = (yr * a).sum(axis=1)
    else:
        out = y * jax.nn.sigmoid(att)[:, :, None, None]
    return out


if __name__ == "__main__":
    # SplAtConv2d(in_channels=4, channels=4, kernel_size=3, groups=2, radix=2)
    in_channels, channels, kernel_size = 4, 4, 3
    groups, radix = 2, 2
    stride, dilation = 1, 1
    padding = (kernel_size - 1) // 2
    B, H, W = 2, 16, 16

    key = jax.random.PRNGKey(0)
    kx, kp = jax.random.split(key)
    x = jax.random.normal(kx, (B, in_channels, H, W), jnp.float32)
    params = make_params(kp, in_channels, channels, kernel_size, groups, radix)

    out = splat_conv2d_forward(x, params, channels=channels, radix=radix, groups=groups,
                               kernel_size=kernel_size, stride=stride,
                               padding=padding, dilation=dilation)
    out = jax.block_until_ready(out)

    ref = jax.block_until_ready(
        reference_forward(x, params, channels=channels, radix=radix, groups=groups,
                          stride=stride, padding=padding, dilation=dilation))

    assert out.shape == ref.shape == (B, channels, H, W)
    # bf16 conv inputs (and bf16 fusion matmul) -> bf16-level tolerance vs the f32 reference
    assert bool(jnp.allclose(out, ref, atol=2e-2, rtol=2e-2)), "mismatch vs JAX reference"
    print("KERNEL_OK")
</pallas_src>

<mosaic_0001>
module attributes {stable_mosaic.version = 11 : i64} {
  func.func @_splat_kernel(%arg0: i32, %arg1: memref<1x36x256xbf16, #tpu.memory_space<vmem>>, %arg2: memref<8x36xbf16, #tpu.memory_space<vmem>>, %arg3: memref<32x4xf32, #tpu.memory_space<vmem>>, %arg4: memref<8x32xf32, #tpu.memory_space<vmem>>, %arg5: memref<8x1xf32, #tpu.memory_space<vmem>>, %arg6: memref<8x1xf32, #tpu.memory_space<vmem>>, %arg7: memref<32x1xf32, #tpu.memory_space<vmem>>, %arg8: memref<32x1xf32, #tpu.memory_space<vmem>>, %arg9: memref<8x1xf32, #tpu.memory_space<vmem>>, %arg10: memref<8x8xf32, #tpu.memory_space<vmem>>, %arg11: memref<4x8xf32, #tpu.memory_space<vmem>>, %arg12: memref<1x4x256xf32, #tpu.memory_space<vmem>>) attributes {dimension_semantics = [#tpu.dimension_semantics<parallel>], iteration_bounds = array<i64: 2>, scalar_prefetch = 0 : i64, scratch_operands = 0 : i64, tpu.core_type = #tpu.core_type<tc>, window_params = [{transform_indices = @transform_0, window_bounds = array<i64: 1, 36, 256>}, {pipeline_mode = #tpu.pipeline_mode<synchronous>, transform_indices = @transform_1, window_bounds = array<i64: 8, 36>}, {pipeline_mode = #tpu.pipeline_mode<synchronous>, transform_indices = @transform_2, window_bounds = array<i64: 32, 4>}, {pipeline_mode = #tpu.pipeline_mode<synchronous>, transform_indices = @transform_3, window_bounds = array<i64: 8, 32>}, {pipeline_mode = #tpu.pipeline_mode<synchronous>, transform_indices = @transform_4, window_bounds = array<i64: 8, 1>}, {pipeline_mode = #tpu.pipeline_mode<synchronous>, transform_indices = @transform_5, window_bounds = array<i64: 8, 1>}, {pipeline_mode = #tpu.pipeline_mode<synchronous>, transform_indices = @transform_6, window_bounds = array<i64: 32, 1>}, {pipeline_mode = #tpu.pipeline_mode<synchronous>, transform_indices = @transform_7, window_bounds = array<i64: 32, 1>}, {pipeline_mode = #tpu.pipeline_mode<synchronous>, transform_indices = @transform_8, window_bounds = array<i64: 8, 1>}, {pipeline_mode = #tpu.pipeline_mode<synchronous>, transform_indices = @transform_9, window_bounds = array<i64: 8, 8>}, {pipeline_mode = #tpu.pipeline_mode<synchronous>, transform_indices = @transform_10, window_bounds = array<i64: 4, 8>}, {transform_indices = @transform_11, window_bounds = array<i64: 1, 4, 256>}]} {
    %c0 = arith.constant 0 : index
    %c0_0 = arith.constant 0 : index
    %0 = vector.load %arg2[%c0, %c0_0] : memref<8x36xbf16, #tpu.memory_space<vmem>>, vector<8x36xbf16>
    %c0_1 = arith.constant 0 : index
    %c0_2 = arith.constant 0 : index
    %c0_3 = arith.constant 0 : index
    %1 = vector.load %arg1[%c0_1, %c0_2, %c0_3] : memref<1x36x256xbf16, #tpu.memory_space<vmem>>, vector<1x36x256xbf16>
    %2 = vector.shape_cast %1 : vector<1x36x256xbf16> to vector<36x256xbf16>
    %cst = arith.constant dense<0.000000e+00> : vector<8x256xf32>
    %3 = tpu.matmul %0, %2, %cst {dimension_numbers = #tpu.dot_dimension_numbers<[1], [0], [0], [1], [0, 0, 1, 1], [], []>} : vector<8x36xbf16>, vector<36x256xbf16>, vector<8x256xf32> -> vector<8x256xf32>
    %c0_4 = arith.constant 0 : index
    %c0_5 = arith.constant 0 : index
    %4 = vector.load %arg5[%c0_4, %c0_5] : memref<8x1xf32, #tpu.memory_space<vmem>>, vector<8x1xf32>
    %5 = vector.broadcast %4 : vector<8x1xf32> to vector<8x256xf32>
    %6 = arith.mulf %3, %5 : vector<8x256xf32>
    %c0_6 = arith.constant 0 : index
    %c0_7 = arith.constant 0 : index
    %7 = vector.load %arg6[%c0_6, %c0_7] : memref<8x1xf32, #tpu.memory_space<vmem>>, vector<8x1xf32>
    %8 = vector.broadcast %7 : vector<8x1xf32> to vector<8x256xf32>
    %9 = arith.addf %6, %8 : vector<8x256xf32>
    %cst_8 = arith.constant 0.000000e+00 : f32
    %10 = vector.broadcast %cst_8 : f32 to vector<8x256xf32>
    %11 = arith.maximumf %9, %10 : vector<8x256xf32>
    %cst_9 = arith.constant dense<0.000000e+00> : vector<8xf32>
    %12 = vector.multi_reduction <add>, %11, %cst_9 [1] : vector<8x256xf32> to vector<8xf32>
    %13 = vector.shape_cast %12 : vector<8xf32> to vector<8x1xf32>
    %cst_10 = arith.constant 3.906250e-03 : f32
    %14 = vector.broadcast %cst_10 : f32 to vector<8x1xf32>
    %15 = arith.mulf %13, %14 : vector<8x1xf32>
    %c0_11 = arith.constant 0 : index
    %c0_12 = arith.constant 0 : index
    %16 = vector.load %arg11[%c0_11, %c0_12] : memref<4x8xf32, #tpu.memory_space<vmem>>, vector<4x8xf32>
    %cst_13 = arith.constant dense<0.000000e+00> : vector<4x1xf32>
    %17 = tpu.matmul %16, %15, %cst_13 {dimension_numbers = #tpu.dot_dimension_numbers<[1], [0], [0], [1], [0, 0, 1, 1], [], []>} : vector<4x8xf32>, vector<8x1xf32>, vector<4x1xf32> -> vector<4x1xf32>
    %c0_14 = arith.constant 0 : index
    %c0_15 = arith.constant 0 : index
    %18 = vector.load %arg3[%c0_14, %c0_15] : memref<32x4xf32, #tpu.memory_space<vmem>>, vector<32x4xf32>
    %cst_16 = arith.constant dense<0.000000e+00> : vector<32x1xf32>
    %19 = tpu.matmul %18, %17, %cst_16 {dimension_numbers = #tpu.dot_dimension_numbers<[1], [0], [0], [1], [0, 0, 1, 1], [], []>} : vector<32x4xf32>, vector<4x1xf32>, vector<32x1xf32> -> vector<32x1xf32>
    %c0_17 = arith.constant 0 : index
    %c0_18 = arith.constant 0 : index
    %20 = vector.load %arg7[%c0_17, %c0_18] : memref<32x1xf32, #tpu.memory_space<vmem>>, vector<32x1xf32>
    %21 = arith.mulf %19, %20 : vector<32x1xf32>
    %c0_19 = arith.constant 0 : index
    %c0_20 = arith.constant 0 : index
    %22 = vector.load %arg8[%c0_19, %c0_20] : memref<32x1xf32, #tpu.memory_space<vmem>>, vector<32x1xf32>
    %23 = arith.addf %21, %22 : vector<32x1xf32>
    %cst_21 = arith.constant 0.000000e+00 : f32
    %24 = vector.broadcast %cst_21 : f32 to vector<32x1xf32>
    %25 = arith.maximumf %23, %24 : vector<32x1xf32>
    %c0_22 = arith.constant 0 : index
    %c0_23 = arith.constant 0 : index
    %26 = vector.load %arg4[%c0_22, %c0_23] : memref<8x32xf32, #tpu.memory_space<vmem>>, vector<8x32xf32>
    %cst_24 = arith.constant dense<0.000000e+00> : vector<8x1xf32>
    %27 = tpu.matmul %26, %25, %cst_24 {dimension_numbers = #tpu.dot_dimension_numbers<[1], [0], [0], [1], [0, 0, 1, 1], [], []>} : vector<8x32xf32>, vector<32x1xf32>, vector<8x1xf32> -> vector<8x1xf32>
    %c0_25 = arith.constant 0 : index
    %c0_26 = arith.constant 0 : index
    %28 = vector.load %arg9[%c0_25, %c0_26] : memref<8x1xf32, #tpu.memory_space<vmem>>, vector<8x1xf32>
    %29 = arith.addf %27, %28 : vector<8x1xf32>
    %cst_27 = arith.constant dense<0xFF800000> : vector<1xf32>
    %30 = vector.multi_reduction <maximumf>, %29, %cst_27 [0] : vector<8x1xf32> to vector<1xf32>
    %31 = vector.shape_cast %30 : vector<1xf32> to vector<1x1xf32>
    %32 = vector.broadcast %31 : vector<1x1xf32> to vector<8x1xf32>
    %33 = arith.subf %29, %32 : vector<8x1xf32>
    %34 = math.exp %33 : vector<8x1xf32>
    %c0_28 = arith.constant 0 : index
    %c0_29 = arith.constant 0 : index
    %35 = vector.load %arg10[%c0_28, %c0_29] : memref<8x8xf32, #tpu.memory_space<vmem>>, vector<8x8xf32>
    %cst_30 = arith.constant dense<0.000000e+00> : vector<8x1xf32>
    %36 = tpu.matmul %35, %34, %cst_30 {dimension_numbers = #tpu.dot_dimension_numbers<[1], [0], [0], [1], [0, 0, 1, 1], [], []>} : vector<8x8xf32>, vector<8x1xf32>, vector<8x1xf32> -> vector<8x1xf32>
    %37 = arith.divf %34, %36 : vector<8x1xf32>
    %38 = vector.broadcast %37 : vector<8x1xf32> to vector<8x256xf32>
    %39 = arith.mulf %11, %38 : vector<8x256xf32>
    %40 = arith.truncf %39 : vector<8x256xf32> to vector<8x256xbf16>
    %41 = arith.truncf %16 : vector<4x8xf32> to vector<4x8xbf16>
    %cst_31 = arith.constant dense<0.000000e+00> : vector<4x256xf32>
    %42 = tpu.matmul %41, %40, %cst_31 {dimension_numbers = #tpu.dot_dimension_numbers<[1], [0], [0], [1], [0, 0, 1, 1], [], []>} : vector<4x8xbf16>, vector<8x256xbf16>, vector<4x256xf32> -> vector<4x256xf32>
    %c0_32 = arith.constant 0 : index
    %c0_33 = arith.constant 0 : index
    %c0_34 = arith.constant 0 : index
    %43 = vector.load %arg12[%c0_32, %c0_33, %c0_34] : memref<1x4x256xf32, #tpu.memory_space<vmem>>, vector<1x4x256xf32>
    %44 = vector.shape_cast %43 : vector<1x4x256xf32> to vector<4x256xf32>
    %45 = vector.shape_cast %42 : vector<4x256xf32> to vector<1x4x256xf32>
    tpu.vector_store %arg12[%c0_32, %c0_33, %c0_34], %45 {strides = array<i32>} : memref<1x4x256xf32, #tpu.memory_space<vmem>>, vector<1x4x256xf32>,
    return
  }
  func.func @transform_0(%arg0: i32) -> (i32, i32, i32) {
    %c0_i32 = arith.constant 0 : i32
    %c0_i32_0 = arith.constant 0 : i32
    %c0_i32_1 = arith.constant 0 : i32
    return %arg0, %c0_i32, %c0_i32_0 : i32, i32, i32
  }
  func.func @transform_1(%arg0: i32) -> (i32, i32) {
    %c0_i32 = arith.constant 0 : i32
    %c0_i32_0 = arith.constant 0 : i32
    %c0_i32_1 = arith.constant 0 : i32
    return %c0_i32, %c0_i32_0 : i32, i32
  }
  func.func @transform_2(%arg0: i32) -> (i32, i32) {
    %c0_i32 = arith.constant 0 : i32
    %c0_i32_0 = arith.constant 0 : i32
    %c0_i32_1 = arith.constant 0 : i32
    return %c0_i32, %c0_i32_0 : i32, i32
  }
  func.func @transform_3(%arg0: i32) -> (i32, i32) {
    %c0_i32 = arith.constant 0 : i32
    %c0_i32_0 = arith.constant 0 : i32
    %c0_i32_1 = arith.constant 0 : i32
    return %c0_i32, %c0_i32_0 : i32, i32
  }
  func.func @transform_4(%arg0: i32) -> (i32, i32) {
    %c0_i32 = arith.constant 0 : i32
    %c0_i32_0 = arith.constant 0 : i32
    %c0_i32_1 = arith.constant 0 : i32
    return %c0_i32, %c0_i32_0 : i32, i32
  }
  func.func @transform_5(%arg0: i32) -> (i32, i32) {
    %c0_i32 = arith.constant 0 : i32
    %c0_i32_0 = arith.constant 0 : i32
    %c0_i32_1 = arith.constant 0 : i32
    return %c0_i32, %c0_i32_0 : i32, i32
  }
  func.func @transform_6(%arg0: i32) -> (i32, i32) {
    %c0_i32 = arith.constant 0 : i32
    %c0_i32_0 = arith.constant 0 : i32
    %c0_i32_1 = arith.constant 0 : i32
    return %c0_i32, %c0_i32_0 : i32, i32
  }
  func.func @transform_7(%arg0: i32) -> (i32, i32) {
    %c0_i32 = arith.constant 0 : i32
    %c0_i32_0 = arith.constant 0 : i32
    %c0_i32_1 = arith.constant 0 : i32
    return %c0_i32, %c0_i32_0 : i32, i32
  }
  func.func @transform_8(%arg0: i32) -> (i32, i32) {
    %c0_i32 = arith.constant 0 : i32
    %c0_i32_0 = arith.constant 0 : i32
    %c0_i32_1 = arith.constant 0 : i32
    return %c0_i32, %c0_i32_0 : i32, i32
  }
  func.func @transform_9(%arg0: i32) -> (i32, i32) {
    %c0_i32 = arith.constant 0 : i32
    %c0_i32_0 = arith.constant 0 : i32
    %c0_i32_1 = arith.constant 0 : i32
    return %c0_i32, %c0_i32_0 : i32, i32
  }
  func.func @transform_10(%arg0: i32) -> (i32, i32) {
    %c0_i32 = arith.constant 0 : i32
    %c0_i32_0 = arith.constant 0 : i32
    %c0_i32_1 = arith.constant 0 : i32
    return %c0_i32, %c0_i32_0 : i32, i32
  }
  func.func @transform_11(%arg0: i32) -> (i32, i32, i32) {
    %c0_i32 = arith.constant 0 : i32
    %c0_i32_0 = arith.constant 0 : i32
    %c0_i32_1 = arith.constant 0 : i32
    return %arg0, %c0_i32, %c0_i32_0 : i32, i32, i32
  }
}

</mosaic_0001>

<bundles_post_ra>
// kernel: tpu_custom_call.1
= control target key start
LH: loop header
LB: loop body
LE: loop exit
PB: predicated region body
PF: predicated region fallthrough
CT: control target
= control target key end

     0   :  { %s1446_s0 = inlined_call_operand.vmem [shape: bf16[2,36,256], index: 0, kind: input, shape index: {}]   ;;  %s1447_s1 = inlined_call_operand.vmem [shape: bf16[8,36], index: 1, kind: input, shape index: {}]   ;;  %s1448_s2 = inlined_call_operand.vmem [shape: f32[32,4], index: 2, kind: input, shape index: {}]   ;;  %s1449_s3 = inlined_call_operand.vmem [shape: f32[8,32], index: 3, kind: input, shape index: {}]   ;;  %s1450_s4 = inlined_call_operand.vmem [shape: f32[8,1], index: 4, kind: input, shape index: {}]   ;;  %s1451_s5 = inlined_call_operand.vmem [shape: f32[8,1], index: 5, kind: input, shape index: {}]   ;;  %s1452_s6 = inlined_call_operand.vmem [shape: f32[32,1], index: 6, kind: input, shape index: {}]   ;;  %s1453_s7 = inlined_call_operand.vmem [shape: f32[32,1], index: 7, kind: input, shape index: {}]   ;;  %s1454_s8 = inlined_call_operand.vmem [shape: f32[8,1], index: 8, kind: input, shape index: {}]   ;;  %s1455_s9 = inlined_call_operand.vmem [shape: f32[8,8], index: 9, kind: input, shape index: {}]   ;;  %s1456_s10 = inlined_call_operand.vmem [shape: f32[4,8], index: 10, kind: input, shape index: {}]   ;;  %s1457_s11 = inlined_call_operand.hbm [shape: f32[2,4,256], index: 11, kind: output, shape index: {}]  }
   0x1   :  { %1458 = sst [smem:[#allocation5_spill]] %s1446_s0 }
   0x2   :  { %16 = vsyncpa [#allocation3], 0 }
   0x3   :  { %18 = vsyncpa [#allocation3 + $0x1], 0  ;;  %s1260_s17 = smov 0   ;;  %s1262_s18 = smov 0  }
   0x4   :  { %s1264_s19 = smov 0   ;;  %s1266_s20 = smov 0  }
   0x5 LB: > { %s1281_s21 = sadd.s32 4294967295, %s1193_s20   ;;  %s994_s22 = sadd.s32 4294967294, %s1193_s20   ;;  %s1193_s20 = sphi %s1266_s20, %s1465_s20   ;;  %s1189_s19 = sphi %s1264_s19, %s1464_s19   ;;  %s1185_s18 = sphi %s1262_s18, %s1463_s18   ;;  %s1181_s17 = sphi %s1260_s17, %s1462_s17  }
   0x6   : > { %s1285_s23 = sadd.s32 1, %s1193_s20   ;;  %s267_s24 = sadd.s32 1, %s1189_s19 }
   0x7   : > { %s264_s25 = ssub.s32 %s1193_s20, %s1285_s23  ;;  %p277_p0 = scmp.ne.s32.totalorder %s1189_s19, %s1185_s18 }
   0x8   : > { %p265_p1 = scmp.eq.s32.totalorder %s264_s25, 0  ;;  %p278_p2 = scmp.eq.s32.totalorder %s1281_s21, 1 }
   0x9   : > { %p283_p3 = scmp.ne.s32.totalorder %s1185_s18, %s1181_s17  ;;  %p284_p4 = scmp.eq.s32.totalorder %s994_s22, 1 }
   0xa   : > { %s1296_s26 = scalar_select %p265_p1, %s1189_s19, %s267_s24  }
   0xb   : > { %p1298_p5 = por %p278_p2, %p277_p0  ;;  %p1302_p6 = por %p284_p4, %p283_p3 }
   0xc   : > { %p997_p7 = scmp.ge.s32.totalorder %s1193_s20, 1  ;;  %p340_p8 = scmp.lt.s32.totalorder %s1193_s20, 3 }
   0xe   : > { %p341_p9 = pnand %p997_p7, %p340_p8 }
   0xf   : > { %p380_p10 = scmp.lt.s32.totalorder (!%p341_p9), %s1281_s21, 1  ;;  %v1195_v0 = vmov (!%p341_p9), 0   ;;  %v469_v1 = vld [vmem:[%s1450_s4] sm:$0xff] (!%p341_p9)  ;;  %s1461_s0 = sld [smem:[#allocation5_spill]] (!%p341_p9)  ;;  %vm421_vm0 = vcmask (!%p341_p9), 1041408   ;;  %vm417_vm1 = vcmask (!%p341_p9), 293888  }
  0x10   : > { %344 = sbr.rel (%p341_p9) target bundleno = 1682 (0x692), region = 64  ;;  %460 = vmatprep.mubr.bf16.mxu0 (!%p341_p9), %v1195_v0  ;;  %1117 = vset.pattern.permute.xlu0 (!%p341_p9), %v1195_v0  ;;  %v477_v2 = vld [vmem:[%s1451_s5] sm:$0xff] (!%p341_p9)  ;;  %v1196_v25 = vmov (!%p341_p9), 0.0   ;;  %vm1197_vm2 = vmmov (!%p341_p9), 0   ;;  %vm492_vm3 = vcmask (!%p341_p9), 64512   ;;  %vm570_vm4 = vcmask (!%p341_p9), 31744  }
  0x11   : > { %472 = vperm.xlu0 (!%p341_p9), %1117, %v469_v1   ;;  %1118 = vset.pattern.permute.xlu1 (!%p341_p9), %v1195_v0  ;;  %v386_v11 = vld [vmem:[%s1447_s1] sm:$0xf] (!%p341_p9)  ;;  %vm583_vm5 = vcmask (!%p341_p9), 1043456   ;;  %v567_v31 = vld [vmem:[%s1448_s2 + $0x8] sm:$0xff] (!%p341_p9)  ;;  %v568_v33 = vld [vmem:[%s1448_s2 + $0x10] sm:$0xff] (!%p341_p9)  ;;  %v1198_v35 = vmov (!%p341_p9), 0.0|0.0  }
  0x12   : > { %1038 = vmatprep.subr.mxu1 (!%p341_p9), %v1196_v25  ;;  %1040 = vmatprep.mubr.msk.f32.mxu1 (!%p341_p9), %vm1197_vm2, %v1196_v25  ;;  %v1336_v28 = vld [vmem:[%s1456_s10] sm:$0xf] (!%p341_p9)  ;;  %v569_v34 = vld [vmem:[%s1448_s2 + $0x18] sm:$0xff] (!%p341_p9)  ;;  %v673_v36 = vld [vmem:[%s1452_s6 + $0x8] sm:$0xff] (!%p341_p9)  ;;  %vm694_vm6 = vcmask (!%p341_p9), 261120   ;;  %vm768_vm7 = vcmask (!%p341_p9), 7168  }
  0x13   : > { %v566_v29 = vld [vmem:[%s1448_s2] sm:$0xff] (!%p341_p9)  ;;  %v681_v39 = vld [vmem:[%s1453_s7 + $0x8] sm:$0xff] (!%p341_p9)  ;;  %v675_v44 = vld [vmem:[%s1452_s6 + $0x18] sm:$0xff] (!%p341_p9)  ;;  %s377_s13 = sand.u32 (!%p341_p9), 1, %s1185_s18  }
  0x14   : > { %v672_v37 = vld [vmem:[%s1452_s6] sm:$0xff] (!%p341_p9)  ;;  %v674_v46 = vld [vmem:[%s1452_s6 + $0x10] sm:$0xff] (!%p341_p9)  ;;  %v683_v49 = vld [vmem:[%s1453_s7 + $0x18] sm:$0xff] (!%p341_p9)  ;;  %s998_s14 = sshll.u32 (!%p341_p9), %s377_s13, 3  ;;  %s921_s30 = scalar_lea.sflag (!%p341_p9), [#allocation3], %s377_s13 }
  0x15   : > { %480 = vperm.xlu0 (!%p341_p9), %1117, %v477_v2   ;;  %v680_v42 = vld [vmem:[%s1453_s7] sm:$0xff] (!%p341_p9)  ;;  %v682_v53 = vld [vmem:[%s1453_s7 + $0x10] sm:$0xff] (!%p341_p9)  ;;  %s379_s16 = scalar_lea.vmem (!%p341_p9), [#allocation2], %s998_s14 }
  0x16   : > { %v692_v62 = vld [vmem:[%s1449_s3] sm:$0xff] (!%p341_p9)  ;;  %s935_s22 = sshll.u32 (!%p341_p9), %s379_s16, 4  ;;  %s1406_s22 = int_to_ptr.vmem [resolvable:$true] %s935_s22 }
  0x17   : > { %s381_s12 = scalar_select %p380_p10, %s1281_s21, 1  ;;  %v693_v63 = vld [vmem:[%s1454_s8] sm:$0xff] }
  0x19   : > { %s1073_s15 = smul.u32 40, %s381_s12  ;;  %s1199_s12 = smov [#allocation2]  }
  0x1a   : > { %s1135_s14 = sshll.u32 %s1199_s12, 4  ;;  %s1136_s14 = int_to_ptr.vmem [resolvable:$false] %s1135_s14 }
  0x1b   : > { %s384_s24 = scalar_lea.vmem %s1461_s0, %s1073_s15  ;;  %s1023_s15 = sshll.u32 %s1281_s21, 7 }
  0x1c   : > { %v1119_v3 = vld [vmem:[%s384_s24 + $0x4] ss:$8 sps:$4 sm:$0xff]   ;;  %v1121_v4 = vld [vmem:[%s384_s24] ss:$8 sps:$4 sm:$0xff]   ;;  %v1122_v5 = vld [vmem:[%s384_s24 + $0x14] ss:$8 sps:$4 sm:$0xff]   ;;  %s1404_s29 = scalar_lea.hbm %s1457_s11, %s1023_s15  ;;  %p1138_p0 = scmp.lt.s32.totalorder %s1406_s22, %s1136_s14 }
  0x1d   : > { %428 = vmatprep.subr.bf16.mxu0 %v1119_v3  ;;  %v391_v6 = vld [vmem:[%s384_s24 + $0x20] sm:$0x33]  ;;  %v1124_v7 = vld [vmem:[%s384_s24 + $0x10] ss:$8 sps:$4 sm:$0xff]   ;;  %s1131_s21 = scalar_lea.vmem %s1406_s22, 128  ;;  %s1137_s0 = scalar_lea.vmem %s1136_s14, 256 }
  0x1e   : > { %429 = vmatpush1.bf16.msra.mxu0 %v1121_v4  ;;  %v1005_v8 = vcombine.high %v391_v6, %v391_v6  ;;  %v1004_v9 = vcombine.low %v391_v6, %v391_v6  ;;  %p1132_p11 = scmp.ne.s32.totalorder %s1406_s22, %s1131_s21  ;;  %p1139_p1 = scmp.lt.s32.totalorder %s1137_s0, %s1131_s21 }
  0x1f   : > { %430 = vmatprep.subr.bf16.mxu0 %v1122_v5 }
  0x20   : > { %v423_v10 = vsel %vm421_vm0, %v1004_v9, 0  ;;  %p1133_p12 = pnand %p1132_p11, %p1298_p5  ;;  %p1140_p2 = por %p1139_p1, %p1138_p0 }
  0x22   : > { %431 = vmatpush1.bf16.msra.mxu0 %v1124_v7  ;;  %p1134_p13 = pneg %p1133_p12 }
  0x23   : > { %1006 = vmatprep.subr.msk.bf16.mxu0 %vm421_vm0, %v1005_v8 }
  0x24   : > { %p1141_p3 = pnand %p1140_p2, %p1134_p13 }
  0x26   : > { %433 = vmatpush1.bf16.msra.mxu0 %v423_v10 }
  0x29   : > { %1007 = vmatmul.mubr.msk.bf16.vlgmr.msra.gmra.mrb[0].mxu0 %vm417_vm1, %v386_v11 }
  0x2a   : > { %906 = vmatprep.mubr.bf16.mxu0 %v1195_v0 }
  0x90   : > { %v473_v12 = vpop.permute.xlu0 %472 }
  0x94   : > { %v481_v16 = vpop.permute.xlu0 %480 }
  0xfc   : > { %v462_v13 = vpop.f32.mrb[0].mxu0 }
  0xfd   : > { %v475_v14 = vmul.f32 %v473_v12, %v462_v13  ;;  %v464_v15 = vpop.f32.mrb[1].mxu0 }
  0xfe   : > { %v476_v17 = vmul.f32 %v473_v12, %v464_v15  ;;  %v466_v18 = vpop.f32.mrb[2].mxu0  ;;  %v779_v12 = vld [vmem:[%s1455_s9] sm:$0xff] }
  0xff   : > { %v467_v19 = vpop.f32.mrb[3].mxu0  ;;  %v1322_v20 = vadd.f32 %v481_v16, %v475_v14 }
 0x100   : > { %v1324_v21 = vadd.f32 %v481_v16, %v476_v17 }
 0x101   : > { %v485_v22 = vmax.f32 %v1322_v20, 0.0 }
 0x102   : > { %v486_v23 = vmax.f32 %v1324_v21, 0.0 }
 0x104   : > { %v487_v24 = vadd.f32 %v486_v23, %v485_v22 }
 0x106   : > { %488 = vadd.xlane.f32.xlu1 %v487_v24 }
 0x193   : > { %v489_v26 = vpop.xlane.xlu1 %488 }
 0x194   : > { %v490_v27 = vmul.f32 0.00390625, %v489_v26 }
 0x196   : > { %1039 = vmatpush3.msra.mxu1 %v490_v27  ;;  %v864_v27 = vpack.c.bf16 %v1336_v28, %v1336_v28 }
 0x197   : > { %1041 = vmatmul.mubr.msk.f32.vlgmr.msra.gmra.mrb[0].mxu1 %vm492_vm3, %v1336_v28 }
 0x198   : > { %1045 = vmatprep.mubr.msk.f32.mxu1 %vm570_vm4, %v566_v29 }
 0x26a   : > { %v562_v30 = vpop.f32.mrb[0].mxu1 }
 0x26b   : > { %v1042_v32 = vpop.f32.mrb[1].mxu1  ;;  %1043 = vmatprep.subr.msk.mxu1 %vm583_vm5, %v562_v30 }
 0x26c   : > { %1044 = vmatpush3.msk.msra.mxu1 %vm583_vm5, %v562_v30 }
 0x26d   : > { %1046 = vmatmul.mubr.msk.f32.vlgmr.msra.gmra.mrb[2].mxu1 %vm570_vm4, %v567_v31  ;;  %1067 = vmatprep.subr.bf16.mxu1 %v1198_v35 }
 0x26e   : > { %1048 = vmatprep.mubr.msk.f32.mxu1 %vm570_vm4, %v568_v33 }
 0x271   : > { %1049 = vmatmul.mubr.msk.f32.gmra.mrb[4].mxu1 %vm570_vm4, %v569_v34 }
 0x272   : > { %1059 = vmatprep.mubr.msk.f32.mxu1 %vm1197_vm2, %v1196_v25 }
 0x340   : > { %v1047_v38 = vpop.f32.mrb[2].mxu1 }
 0x341   : > { %v677_v40 = vmul.f32 %v1047_v38, %v673_v36  ;;  %v653_v41 = vpop.f32.mrb[3].mxu1 }
 0x342   : > { %v676_v43 = vmul.f32 %v672_v37, %v653_v41 }
 0x343   : > { %v685_v45 = vadd.f32 %v681_v39, %v677_v40 }
 0x344   : > { %v684_v47 = vadd.f32 %v680_v42, %v676_v43  ;;  %v1050_v48 = vpop.f32.mrb[4].mxu1 }
 0x345   : > { %v689_v50 = vmax.f32 %v685_v45, 0.0  ;;  %v679_v51 = vmul.f32 %v1050_v48, %v675_v44  ;;  %v663_v52 = vpop.f32.mrb[5].mxu1 }
 0x346   : > { %v688_v54 = vmax.f32 %v684_v47, 0.0  ;;  %v678_v55 = vmul.f32 %v674_v46, %v663_v52 }
 0x347   : > { %v687_v56 = vadd.f32 %v683_v49, %v679_v51 }
 0x348   : > { %v1068_v57 = vpack.c.bf16 %v689_v50, %v688_v54  ;;  %v686_v58 = vadd.f32 %v682_v53, %v678_v55 }
 0x349   : > { %v691_v59 = vmax.f32 %v687_v56, 0.0 }
 0x34a   : > { %v690_v60 = vmax.f32 %v686_v58, 0.0  ;;  %1069 = vmatpush3.bf16.msra.mxu1 %v1068_v57 }
 0x34b   : > { %1070 = vmatprep.subr.bf16.mxu1 %v1198_v35 }
 0x34c   : > { %v1071_v61 = vpack.c.bf16 %v691_v59, %v690_v60 }
 0x34e   : > { %1072 = vmatpush3.bf16.msra.mxu1 %v1071_v61 }
 0x34f   : > { %1062 = vmatprep.subr.mxu1 %v1196_v25 }
 0x351   : > { %1060 = vmatmul.mubr.msk.f32.vlgmr.msra.gmra.mrb[6].mxu1 %vm694_vm6, %v692_v62 }
 0x352   : > { %1064 = vmatprep.mubr.msk.f32.mxu1 %vm1197_vm2, %v1196_v25 }
 0x424   : > { %v764_v0 = vpop.f32.mrb[6].mxu1 }
 0x425   : > { %v765_v1 = vadd.f32 %v764_v0, %v693_v63  ;;  %v1061_v2 = vpop.f32.mrb[7].mxu1 }
 0x427   : > { %v769_v3 = vsel %vm768_vm7, %v765_v1, -inf }
 0x428   : > { %v770_v4 = vrot.slane %v769_v3, 4 }
 0x42a   : > { %v771_v5 = vmax.f32 %v769_v3, %v770_v4 }
 0x42c   : > { %v772_v6 = vrot.slane %v771_v5, 2 }
 0x42e   : > { %v773_v7 = vmax.f32 %v771_v5, %v772_v6 }
 0x430   : > { %v774_v8 = vrot.slane %v773_v7, 1 }
 0x432   : > { %v775_v9 = vmax.f32 %v773_v7, %v774_v8 }
 0x434   : > { %v776_v10 = vsub.f32 %v765_v1, %v775_v9 }
 0x436   : > { %v777_v11 = vmul.f32 1.442695, %v776_v10 }
 0x438   : > { %1127 = vpow2.f32 %v777_v11 }
 0x442   : > { %v1128_v13 = vpop.eup %1127 }
 0x443   : > { %1063 = vmatpush3.msra.mxu1 %v1128_v13 }
 0x444   : > { %1065 = vmatmul.mubr.msk.f32.vlgmr.msra.gmra.mrb[8].mxu1 %vm492_vm3, %v779_v12 }
 0x517   : > { %v849_v14 = vpop.f32.mrb[8].mxu1 }
 0x518   : > { %1129 = vrcp.f32 %v849_v14  ;;  %v1066_v15 = vpop.f32.mrb[9].mxu1 }
 0x522   : > { %v1130_v16 = vpop.eup %1129 }
 0x523   : > { %v854_v17 = vmul.f32 %v1130_v16, %v1128_v13 }
 0x525   : > { %857 = vperm.xlu1 %1118, %v854_v17  }
 0x5a4   : > { %v858_v18 = vpop.permute.xlu1 %857 }
 0x5a5   : > { %v860_v19 = vmul.f32 %v858_v18, %v485_v22  ;;  %v861_v24 = vmul.f32 %v858_v18, %v486_v23 }
 0x5a7   : > { %v862_v25 = vpack.c.bf16 %v860_v19, %v860_v19  ;;  %v863_v26 = vpack.c.bf16 %v861_v24, %v861_v24 }
 0x5a9   : > { %v869_v29 = vsel %vm583_vm5, %v862_v25, 0  ;;  %1016 = vmatprep.subr.msk.bf16.mxu0 %vm583_vm5, %v863_v26 }
 0x5aa   : > { %875 = vmatpush1.bf16.msra.mxu0 %v869_v29 }
 0x5ad   : > { %1017 = vmatmul.mubr.msk.bf16.vlgmr.msra.gmra.mrb[4].mxu0 %vm492_vm3, %v864_v27 }
 0x680   : > { %v908_v20 = vpop.f32.mrb[4].mxu0 }
 0x681   : > { %v910_v21 = vpop.f32.mrb[5].mxu0 }
 0x682   : > { %v917_v22 = vcombine.low %v908_v20, %v910_v21  ;;  %v912_v23 = vpop.f32.mrb[6].mxu0 }
 0x683   : > { %v913_v28 = vpop.f32.mrb[7].mxu0 }
 0x684   : > { %919 = vst [vmem:[%s379_s16] sm:$0xff] %v917_v22 }
 0x685   : > { %1144 = shalt.err (!%p1141_p3)
}
 0x686   : > { %s1145_s13 = scalar_lea.hbm %s1404_s29, 128  ;;  %s1149_s24 = scalar_lea.hbm %s1457_s11, 256 }
 0x687   : > { %p1146_p4 = scmp.ne.s32.totalorder %s1404_s29, %s1145_s13  ;;  %p1150_p9 = scmp.lt.u32.totalorder %s1404_s29, %s1457_s11 }
 0x688   : > { %p1151_p10 = scmp.lt.u32.totalorder %s1149_s24, %s1145_s13  ;;  %p1153_p12 = scmp.lt.u32.totalorder %s1145_s13, %s1404_s29 }
 0x689   : > { %p1147_p7 = pnand %p1146_p4, %p1298_p5 }
 0x68a   : > { %p1152_p11 = por %p1151_p10, %p1150_p9 }
 0x68b   : > { %p1148_p8 = pneg %p1147_p7 }
 0x68c   : > { %p1154_p13 = por %p1153_p12, %p1152_p11 }
 0x68e   : > { %p1155_p0 = pnand %p1154_p13, %p1148_p8 }
 0x690   : > { %1158 = shalt.err (!%p1155_p0)
}
 0x691   : > { %1074 = dma.vmem_to_hbm [thread:$0]  (%p1298_p5), %s1406_s22, 128, %s1404_s29, %s921_s30  }
 0x692 PF: > { %p1080_p1 = scmp.ge.s32.totalorder %s1193_s20, 2  ;;  %s947_s0 = sand.u32 1, %s1181_s17  }
 0x693   : > { %s948_s21 = scalar_lea.sflag [#allocation3], %s947_s0 }
 0x694   : > { %p1077_p2 = pnand %p1080_p1, %p1302_p6 }
 0x696   : > { %1176 = dma.done.wait (!%p1077_p2), %s948_s21, 128  }
 0x697   : > { %1178 = vsyncadd (!%p1077_p2), %s948_s21, 4294967168  ;;  %p21_p3 = scmp.ge.s32.totalorder %s1285_s23, 4   ;;  %s1462_s17 = smov %s1185_s18 }
 0x698   : > { %s1463_s18 = smov %s1189_s19  ;;  %s1464_s19 = smov %s1296_s26 }
 0x699   : > { %s1465_s20 = smov %s1285_s23  ;;  %23 = sbr.rel (!%p21_p3) target bundleno = 5 (0x5), region = 99 }
 0x6a0   :  { %953 = vsyncpa [#allocation3], 1 }
 0x6a1   :  { %955 = vsyncpa [#allocation3 + $0x1], 1 }

</bundles_post_ra>
